<compile_context>
chip_gen: v7x
topology: tpu7x:2x2x1
jax: 0.10.0
libtpu: 0.0.40
codegen_flags: <defaults>
</compile_context>

<pallas_src>
import functools

import jax
import jax.numpy as jnp
from jax.experimental import pallas as pl
from jax.experimental.pallas import tpu as pltpu

_LANE = 128          # lane width / padded hidden width
_MAX_TILE_B = 4096   # batch tile upper bound (amortizes per-step overhead)


def _round_up(x, m):
    return (x + m - 1) // m * m


def _hypernet_kernel(x_ref, w1_ref, b1_ref, w2_ref, b2_ref, w3_ref, b3_ref,
                     out_ref):
    x = x_ref[...]                                        # (TB, 8)   bf16

    # layer_1 + (dropout = identity) + ReLU.  PDI already packed into x.
    h1 = jnp.dot(x, w1_ref[...], preferred_element_type=jnp.float32)
    h1 = jnp.maximum(h1 + b1_ref[...], 0.0).astype(jnp.bfloat16)   # (TB, 128)

    # layer_2 + (dropout = identity) + ReLU.
    h2 = jnp.dot(h1, w2_ref[...], preferred_element_type=jnp.float32)
    h2 = jnp.maximum(h2 + b2_ref[...], 0.0).astype(jnp.bfloat16)   # (TB, 128)

    # out layer (no activation) -- narrow (TB, 16) f32 store (8x less writeback
    # than a 128-wide padded output).
    o = jnp.dot(h2, w3_ref[...], preferred_element_type=jnp.float32)
    out_ref[...] = (o + b3_ref[...]).astype(out_ref.dtype)


def prep_params(params, n_fp):
    """Pad widths to TPU-friendly sizes and cast matmul weights to bf16.

    Padded rows/cols are zero, so the extra lanes contribute nothing; the
    wrapper slices the real [:, :n_out] output.
    """
    w1, b1 = params["w1"], params["b1"]       # (n_fp+1, l1), (1, l1)
    w2, b2 = params["w2"], params["b2"]       # (l1, l2),     (1, l2)
    w3, b3 = params["w3"], params["b3"]       # (l2, n_out),  (1, n_out)
    l1, l2, n_out = w1.shape[1], w2.shape[1], w3.shape[1]
    L1 = _round_up(l1, _LANE)
    L2 = _round_up(l2, _LANE)
    NO = _round_up(n_out, 16)                 # narrow, lane-legal output width
    NIN = _round_up(n_fp + 1, 8)              # [fp | PDI] packed + sublane pad

    def pad2(a, rows, cols):
        return jnp.pad(a, ((0, rows - a.shape[0]), (0, cols - a.shape[1])))

    return dict(
        w1=pad2(w1, NIN, L1).astype(jnp.bfloat16),       # (8,   128) bf16
        b1=pad2(b1.astype(jnp.float32), 1, L1),          # (1,   128) f32
        w2=pad2(w2, L1, L2).astype(jnp.bfloat16),        # (128, 128) bf16
        b2=pad2(b2.astype(jnp.float32), 1, L2),          # (1,   128) f32
        w3=pad2(w3, L2, NO).astype(jnp.bfloat16),        # (128,  16) bf16
        b3=pad2(b3.astype(jnp.float32), 1, NO),          # (1,    16) f32
    )


@functools.partial(jax.jit, static_argnames=("n_out",))
def visc_hypernet_forward(fp, pdi, kp, n_out=11):
    """fp: (B, n_fp), pdi: (B, 1), kp: prep_params(...). -> (B, n_out) f32."""
    B, n_fp = fp.shape
    nin_pad = kp["w1"].shape[0]               # 8
    l1 = kp["b1"].shape[1]                    # 128
    l2 = kp["b2"].shape[1]                    # 128
    no_pad = kp["b3"].shape[1]                # 16

    # Large tiles to amortize per-step overhead, but keep >= 2 grid steps
    # whenever B allows it so the batch axis can shard across v7x's 2 TCs.
    tile_b = max(8, min(_MAX_TILE_B, _round_up(pl.cdiv(max(B, 1), 2), 8)))
    b_pad = _round_up(max(B, 1), tile_b)
    grid = (b_pad // tile_b,)

    # Single packed, padded bf16 input slab: [fp | PDI | zeros] -> (b_pad, 8).
    # (A caller that already holds a pre-packed bf16 [fp|PDI] slab can skip
    #  these two cheap XLA passes entirely.)
    x = jnp.concatenate(
        [fp.astype(jnp.bfloat16), pdi.reshape(B, 1).astype(jnp.bfloat16)],
        axis=1)
    x_p = jnp.pad(x, ((0, b_pad - B), (0, nin_pad - (n_fp + 1))))

    vmem = pltpu.MemorySpace.VMEM

    def row_spec(shape):                      # streamed over the batch axis
        return pl.BlockSpec(shape, lambda i: (i, 0), memory_space=vmem)

    def fix_spec(a):                          # VMEM-resident weights/biases
        return pl.BlockSpec(a.shape, lambda i: (0, 0), memory_space=vmem)

    flops = 2 * b_pad * (nin_pad * l1 + l1 * l2 + l2 * no_pad)
    bytes_accessed = (
        x_p.size * 2 + b_pad * no_pad * 4
        + sum(int(v.size) * v.dtype.itemsize for v in kp.values()))

    out_pad = pl.pallas_call(
        _hypernet_kernel,
        out_shape=jax.ShapeDtypeStruct((b_pad, no_pad), jnp.float32),
        grid=grid,
        in_specs=[row_spec((tile_b, nin_pad)),
                  fix_spec(kp["w1"]), fix_spec(kp["b1"]),
                  fix_spec(kp["w2"]), fix_spec(kp["b2"]),
                  fix_spec(kp["w3"]), fix_spec(kp["b3"])],
        out_specs=row_spec((tile_b, no_pad)),
        compiler_params=pltpu.CompilerParams(
            dimension_semantics=("parallel",)),
        cost_estimate=pl.CostEstimate(flops=flops, transcendentals=0,
                                      bytes_accessed=bytes_accessed),
    )(x_p, kp["w1"], kp["b1"], kp["w2"], kp["b2"], kp["w3"], kp["b3"])

    return out_pad[:B, :n_out]


def init_params(key, n_fp, l1=120, l2=120, n_out=11):
    """Deterministic init mirroring nn.Linear shapes (weights stored as
    (in, out) so the kernel does x @ W, equivalent to torch's x @ W.T)."""
    ks = jax.random.split(key, 6)

    def linear(kw, kb, fan_in, fan_out):
        bound = 1.0 / jnp.sqrt(jnp.float32(fan_in))
        w = jax.random.uniform(kw, (fan_in, fan_out), jnp.float32,
                               minval=-bound, maxval=bound)
        b = jax.random.uniform(kb, (1, fan_out), jnp.float32,
                               minval=-bound, maxval=bound)
        return w, b

    w1, b1 = linear(ks[0], ks[1], n_fp + 1, l1)
    w2, b2 = linear(ks[2], ks[3], l1, l2)
    w3, b3 = linear(ks[4], ks[5], l2, n_out)
    return dict(w1=w1, b1=b1, w2=w2, b2=b2, w3=w3, b3=b3)


def reference_forward(fp, pdi, kp, n_out=11):
    """Pure-JAX reference mirroring the kernel's numerics (bf16 weights /
    activations, f32 accumulation)."""
    B = fp.shape[0]
    x = jnp.concatenate(
        [fp.astype(jnp.bfloat16), pdi.reshape(B, 1).astype(jnp.bfloat16)],
        axis=1)
    x = jnp.pad(x, ((0, 0), (0, kp["w1"].shape[0] - x.shape[1])))
    h1 = jnp.dot(x, kp["w1"], preferred_element_type=jnp.float32) + kp["b1"]
    h1 = jnp.maximum(h1, 0.0).astype(jnp.bfloat16)
    h2 = jnp.dot(h1, kp["w2"], preferred_element_type=jnp.float32) + kp["b2"]
    h2 = jnp.maximum(h2, 0.0).astype(jnp.bfloat16)
    o = jnp.dot(h2, kp["w3"], preferred_element_type=jnp.float32) + kp["b3"]
    return o[:, :n_out]


def reference_forward_f32(fp, pdi, raw, n_out=11):
    """True f32 reference from the raw (un-quantized) parameters."""
    x = jnp.concatenate([fp, pdi.reshape(-1, 1)], axis=1).astype(jnp.float32)
    h1 = jnp.maximum(x @ raw["w1"] + raw["b1"], 0.0)
    h2 = jnp.maximum(h1 @ raw["w2"] + raw["b2"], 0.0)
    return (h2 @ raw["w3"] + raw["b3"])[:, :n_out]


if __name__ == "__main__":
    key = jax.random.PRNGKey(0)
    k_fp, k_pdi, k_par = jax.random.split(key, 3)

    B, n_fp = 8, 7                                   # small, forward-consistent
    fp = jax.random.normal(k_fp, (B, n_fp), jnp.float32)
    pdi = jax.random.normal(k_pdi, (B, 1), jnp.float32)

    raw = init_params(k_par, n_fp, l1=120, l2=120, n_out=11)
    kp = prep_params(raw, n_fp)

    out = jax.block_until_ready(visc_hypernet_forward(fp, pdi, kp))
    ref = reference_forward(fp, pdi, kp)
    ref32 = reference_forward_f32(fp, pdi, raw)
    assert out.shape == (B, 11)
    assert jnp.allclose(out, ref, atol=1e-2, rtol=1e-2)
    assert jnp.allclose(out, ref32, atol=5e-2, rtol=5e-2)   # bf16-vs-f32 drift

    # Second check: exercises grid > 1 (2 batch tiles) and row padding.
    B2 = 1037
    fp2 = jax.random.normal(jax.random.PRNGKey(1), (B2, n_fp), jnp.float32)
    pdi2 = jax.random.normal(jax.random.PRNGKey(2), (B2, 1), jnp.float32)
    out2 = jax.block_until_ready(visc_hypernet_forward(fp2, pdi2, kp))
    ref2 = reference_forward(fp2, pdi2, kp)
    assert out2.shape == (B2, 11)
    assert jnp.allclose(out2, ref2, atol=1e-2, rtol=1e-2)

    print("KERNEL_OK")
</pallas_src>

<mosaic_0001>
module attributes {stable_mosaic.version = 11 : i64} {
  func.func @_hypernet_kernel(%arg0: i32, %arg1: memref<8x8xbf16, #tpu.memory_space<vmem>>, %arg2: memref<8x128xbf16, #tpu.memory_space<vmem>>, %arg3: memref<1x128xf32, #tpu.memory_space<vmem>>, %arg4: memref<128x128xbf16, #tpu.memory_space<vmem>>, %arg5: memref<1x128xf32, #tpu.memory_space<vmem>>, %arg6: memref<128x16xbf16, #tpu.memory_space<vmem>>, %arg7: memref<1x16xf32, #tpu.memory_space<vmem>>, %arg8: memref<8x16xf32, #tpu.memory_space<vmem>>) attributes {dimension_semantics = [#tpu.dimension_semantics<parallel>], iteration_bounds = array<i64: 1>, scalar_prefetch = 0 : i64, scratch_operands = 0 : i64, tpu.core_type = #tpu.core_type<tc>, window_params = [{transform_indices = @transform_0, window_bounds = array<i64: 8, 8>}, {pipeline_mode = #tpu.pipeline_mode<synchronous>, transform_indices = @transform_1, window_bounds = array<i64: 8, 128>}, {pipeline_mode = #tpu.pipeline_mode<synchronous>, transform_indices = @transform_2, window_bounds = array<i64: 1, 128>}, {pipeline_mode = #tpu.pipeline_mode<synchronous>, transform_indices = @transform_3, window_bounds = array<i64: 128, 128>}, {pipeline_mode = #tpu.pipeline_mode<synchronous>, transform_indices = @transform_4, window_bounds = array<i64: 1, 128>}, {pipeline_mode = #tpu.pipeline_mode<synchronous>, transform_indices = @transform_5, window_bounds = array<i64: 128, 16>}, {pipeline_mode = #tpu.pipeline_mode<synchronous>, transform_indices = @transform_6, window_bounds = array<i64: 1, 16>}, {transform_indices = @transform_7, window_bounds = array<i64: 8, 16>}]} {
    %c0 = arith.constant 0 : index
    %c0_0 = arith.constant 0 : index
    %0 = vector.load %arg1[%c0, %c0_0] : memref<8x8xbf16, #tpu.memory_space<vmem>>, vector<8x8xbf16>
    %c0_1 = arith.constant 0 : index
    %c0_2 = arith.constant 0 : index
    %1 = vector.load %arg2[%c0_1, %c0_2] : memref<8x128xbf16, #tpu.memory_space<vmem>>, vector<8x128xbf16>
    %cst = arith.constant dense<0.000000e+00> : vector<8x128xf32>
    %2 = tpu.matmul %0, %1, %cst {dimension_numbers = #tpu.dot_dimension_numbers<[1], [0], [0], [1], [0, 0, 1, 1], [], []>} : vector<8x8xbf16>, vector<8x128xbf16>, vector<8x128xf32> -> vector<8x128xf32>
    %c0_3 = arith.constant 0 : index
    %c0_4 = arith.constant 0 : index
    %3 = vector.load %arg3[%c0_3, %c0_4] : memref<1x128xf32, #tpu.memory_space<vmem>>, vector<1x128xf32>
    %4 = vector.broadcast %3 : vector<1x128xf32> to vector<8x128xf32>
    %5 = arith.addf %2, %4 : vector<8x128xf32>
    %cst_5 = arith.constant 0.000000e+00 : f32
    %6 = vector.broadcast %cst_5 : f32 to vector<8x128xf32>
    %7 = arith.maximumf %5, %6 : vector<8x128xf32>
    %8 = arith.truncf %7 : vector<8x128xf32> to vector<8x128xbf16>
    %c0_6 = arith.constant 0 : index
    %c0_7 = arith.constant 0 : index
    %9 = vector.load %arg4[%c0_6, %c0_7] : memref<128x128xbf16, #tpu.memory_space<vmem>>, vector<128x128xbf16>
    %cst_8 = arith.constant dense<0.000000e+00> : vector<8x128xf32>
    %10 = tpu.matmul %8, %9, %cst_8 {dimension_numbers = #tpu.dot_dimension_numbers<[1], [0], [0], [1], [0, 0, 1, 1], [], []>} : vector<8x128xbf16>, vector<128x128xbf16>, vector<8x128xf32> -> vector<8x128xf32>
    %c0_9 = arith.constant 0 : index
    %c0_10 = arith.constant 0 : index
    %11 = vector.load %arg5[%c0_9, %c0_10] : memref<1x128xf32, #tpu.memory_space<vmem>>, vector<1x128xf32>
    %12 = vector.broadcast %11 : vector<1x128xf32> to vector<8x128xf32>
    %13 = arith.addf %10, %12 : vector<8x128xf32>
    %cst_11 = arith.constant 0.000000e+00 : f32
    %14 = vector.broadcast %cst_11 : f32 to vector<8x128xf32>
    %15 = arith.maximumf %13, %14 : vector<8x128xf32>
    %16 = arith.truncf %15 : vector<8x128xf32> to vector<8x128xbf16>
    %c0_12 = arith.constant 0 : index
    %c0_13 = arith.constant 0 : index
    %17 = vector.load %arg6[%c0_12, %c0_13] : memref<128x16xbf16, #tpu.memory_space<vmem>>, vector<128x16xbf16>
    %cst_14 = arith.constant dense<0.000000e+00> : vector<8x16xf32>
    %18 = tpu.matmul %16, %17, %cst_14 {dimension_numbers = #tpu.dot_dimension_numbers<[1], [0], [0], [1], [0, 0, 1, 1], [], []>} : vector<8x128xbf16>, vector<128x16xbf16>, vector<8x16xf32> -> vector<8x16xf32>
    %c0_15 = arith.constant 0 : index
    %c0_16 = arith.constant 0 : index
    %19 = vector.load %arg7[%c0_15, %c0_16] : memref<1x16xf32, #tpu.memory_space<vmem>>, vector<1x16xf32>
    %20 = vector.broadcast %19 : vector<1x16xf32> to vector<8x16xf32>
    %21 = arith.addf %18, %20 : vector<8x16xf32>
    %c0_17 = arith.constant 0 : index
    %c0_18 = arith.constant 0 : index
    %22 = vector.load %arg8[%c0_17, %c0_18] : memref<8x16xf32, #tpu.memory_space<vmem>>, vector<8x16xf32>
    tpu.vector_store %arg8[%c0_17, %c0_18], %21 {strides = array<i32>} : memref<8x16xf32, #tpu.memory_space<vmem>>, vector<8x16xf32>,
    return
  }
  func.func @transform_0(%arg0: i32) -> (i32, i32) {
    %c0_i32 = arith.constant 0 : i32
    %c0_i32_0 = arith.constant 0 : i32
    return %arg0, %c0_i32 : i32, i32
  }
  func.func @transform_1(%arg0: i32) -> (i32, i32) {
    %c0_i32 = arith.constant 0 : i32
    %c0_i32_0 = arith.constant 0 : i32
    %c0_i32_1 = arith.constant 0 : i32
    return %c0_i32, %c0_i32_0 : i32, i32
  }
  func.func @transform_2(%arg0: i32) -> (i32, i32) {
    %c0_i32 = arith.constant 0 : i32
    %c0_i32_0 = arith.constant 0 : i32
    %c0_i32_1 = arith.constant 0 : i32
    return %c0_i32, %c0_i32_0 : i32, i32
  }
  func.func @transform_3(%arg0: i32) -> (i32, i32) {
    %c0_i32 = arith.constant 0 : i32
    %c0_i32_0 = arith.constant 0 : i32
    %c0_i32_1 = arith.constant 0 : i32
    return %c0_i32, %c0_i32_0 : i32, i32
  }
  func.func @transform_4(%arg0: i32) -> (i32, i32) {
    %c0_i32 = arith.constant 0 : i32
    %c0_i32_0 = arith.constant 0 : i32
    %c0_i32_1 = arith.constant 0 : i32
    return %c0_i32, %c0_i32_0 : i32, i32
  }
  func.func @transform_5(%arg0: i32) -> (i32, i32) {
    %c0_i32 = arith.constant 0 : i32
    %c0_i32_0 = arith.constant 0 : i32
    %c0_i32_1 = arith.constant 0 : i32
    return %c0_i32, %c0_i32_0 : i32, i32
  }
  func.func @transform_6(%arg0: i32) -> (i32, i32) {
    %c0_i32 = arith.constant 0 : i32
    %c0_i32_0 = arith.constant 0 : i32
    %c0_i32_1 = arith.constant 0 : i32
    return %c0_i32, %c0_i32_0 : i32, i32
  }
  func.func @transform_7(%arg0: i32) -> (i32, i32) {
    %c0_i32 = arith.constant 0 : i32
    %c0_i32_0 = arith.constant 0 : i32
    return %arg0, %c0_i32 : i32, i32
  }
}

</mosaic_0001>

<bundles_post_ra>
// kernel: visc_hypernet_forward.1
= control target key start
LH: loop header
LB: loop body
LE: loop exit
PB: predicated region body
PF: predicated region fallthrough
CT: control target
= control target key end

     0   :  { %vm41_vm0 = vcmask 1043456   ;;  %vm37_vm1 = vcmask 64512   ;;  %v456_v1 = vmov 0.0   ;;  %vm457_vm2 = vmmov 0   ;;  %s594_s0 = inlined_call_operand.vmem [shape: bf16[8,8], index: 0, kind: input, shape index: {}]   ;;  %s595_s1 = inlined_call_operand.vmem [shape: bf16[8,128], index: 1, kind: input, shape index: {}]   ;;  %s596_s2 = inlined_call_operand.vmem [shape: f32[1,128], index: 2, kind: input, shape index: {}]   ;;  %s597_s3 = inlined_call_operand.vmem [shape: bf16[128,128], index: 3, kind: input, shape index: {}]   ;;  %s598_s4 = inlined_call_operand.vmem [shape: f32[1,128], index: 4, kind: input, shape index: {}]   ;;  %s599_s5 = inlined_call_operand.vmem [shape: bf16[128,16], index: 5, kind: input, shape index: {}]   ;;  %s600_s6 = inlined_call_operand.vmem [shape: f32[1,16], index: 6, kind: input, shape index: {}]   ;;  %s601_s7 = inlined_call_operand.hbm [shape: f32[8,16], index: 7, kind: output, shape index: {}]  }
   0x1   :  { %v29_v0 = vld [vmem:[%s595_s1] sm:$0xf]  ;;  %367 = vmatprep.subr.bf16.mxu0 %v456_v1  ;;  %369 = vmatprep.mubr.msk.bf16.mxu0 %vm457_vm2, %v456_v1  ;;  %v417_v5 = vld [vmem:[%s597_s3 + $0x8] sm:$0xff]   ;;  %v418_v6 = vld [vmem:[%s597_s3 + $0x10] sm:$0xff]  }
   0x2   :  { %v43_v2 = vsel %vm41_vm0, %v29_v0, 0  ;;  %v28_v3 = vld [vmem:[%s594_s0] sm:$0xf]  ;;  %373 = vmatprep.subr.bf16.mxu1 %v456_v1  ;;  %389 = vmatprep.mubr.msk.bf16.mxu1 %vm457_vm2, %v456_v1  ;;  %v419_v7 = vld [vmem:[%s597_s3 + $0x18] sm:$0xff]  }
   0x3   :  { %v416_v4 = vld [vmem:[%s597_s3] sm:$0xff]   ;;  %368 = vmatpush3.bf16.msra.mxu0 %v43_v2 }
   0x4   :  { %374 = vmatpush3.bf16.msra.mxu1 %v416_v4  ;;  %393 = vmatprep.subr.bf16.mxu0 %v456_v1 }
   0x5   :  { %375 = vmatprep.subr.bf16.mxu1 %v456_v1 }
   0x6   :  { %370 = vmatmul.mubr.msk.bf16.vlgmr.msra.gmra.mrb[0].mxu0 %vm37_vm1, %v28_v3 }
   0x7   :  { %409 = vmatprep.mubr.msk.bf16.mxu0 %vm457_vm2, %v456_v1 }
   0x8   :  { %376 = vmatpush3.bf16.msra.mxu1 %v417_v5 }
   0x9   :  { %377 = vmatprep.subr.bf16.mxu1 %v456_v1 }
   0xc   :  { %378 = vmatpush3.bf16.msra.mxu1 %v418_v6 }
   0xd   :  { %379 = vmatprep.subr.bf16.mxu1 %v456_v1 }
   0xe   :  { %12 = vsyncpa [#allocation3], 0  ;;  %v420_v8 = vld [vmem:[%s597_s3 + $0x20] sm:$0xff]   ;;  %v421_v9 = vld [vmem:[%s597_s3 + $0x28] sm:$0xff]   ;;  %s458_s14 = smov [#allocation2]   ;;  %vm311_vm3 = vcmask 130048  }
   0xf   :  { %v422_v10 = vld [vmem:[%s597_s3 + $0x30] sm:$0xff]   ;;  %v423_v11 = vld [vmem:[%s597_s3 + $0x38] sm:$0xff]   ;;  %v424_v12 = vld [vmem:[%s599_s5] sm:$0xff]   ;;  %s319_s15 = sshll.u32 %s458_s14, 4  ;;  %s320_s15 = int_to_ptr.vmem [resolvable:$true] %s319_s15 }
  0x10   :  { %380 = vmatpush3.bf16.msra.mxu1 %v419_v7  ;;  %394 = vmatpush3.bf16.msra.mxu0 %v424_v12  ;;  %v425_v13 = vld [vmem:[%s599_s5 + $0x8] sm:$0xff]   ;;  %v426_v14 = vld [vmem:[%s599_s5 + $0x10] sm:$0xff]   ;;  %v427_v15 = vld [vmem:[%s599_s5 + $0x18] sm:$0xff]   ;;  %p437_p1 = scmp.lt.s32.totalorder %s320_s15, %s320_s15 }
  0x11   :  { %381 = vmatprep.subr.bf16.mxu1 %v456_v1  ;;  %395 = vmatprep.subr.bf16.mxu0 %v456_v1  ;;  %v428_v16 = vld [vmem:[%s599_s5 + $0x20] sm:$0xff]   ;;  %v429_v17 = vld [vmem:[%s599_s5 + $0x28] sm:$0xff]   ;;  %v430_v26 = vld [vmem:[%s599_s5 + $0x30] sm:$0xff]  }
  0x12   :  { %v327_v18 = vld [vmem:[%s596_s2] ss:$0 sm:$0xff]  ;;  %v431_v27 = vld [vmem:[%s599_s5 + $0x38] sm:$0xff]  }
  0x13   :  { %v329_v28 = vld [vmem:[%s598_s4] ss:$0 sm:$0xff]  ;;  %s432_s4 = scalar_lea.vmem %s320_s15, 128 }
  0x14   :  { %382 = vmatpush3.bf16.msra.mxu1 %v420_v8  ;;  %396 = vmatpush3.bf16.msra.mxu0 %v425_v13  ;;  %v338_v36 = vld [vmem:[%s600_s6] ss:$0 sm:$0xff]  ;;  %p433_p0 = scmp.ne.s32.totalorder %s320_s15, %s432_s4  ;;  %p438_p2 = scmp.lt.s32.totalorder %s432_s4, %s432_s4 }
  0x15   :  { %383 = vmatprep.subr.bf16.mxu1 %v456_v1  ;;  %397 = vmatprep.subr.bf16.mxu0 %v456_v1 }
  0x16   :  { %p439_p3 = por %p438_p2, %p437_p1 }
  0x18   :  { %384 = vmatpush3.bf16.msra.mxu1 %v421_v9  ;;  %398 = vmatpush3.bf16.msra.mxu0 %v426_v14  ;;  %p440_p4 = pnand %p439_p3, %p433_p0 }
  0x19   :  { %385 = vmatprep.subr.bf16.mxu1 %v456_v1  ;;  %399 = vmatprep.subr.bf16.mxu0 %v456_v1 }
  0x1c   :  { %386 = vmatpush3.bf16.msra.mxu1 %v422_v10  ;;  %400 = vmatpush3.bf16.msra.mxu0 %v427_v15 }
  0x1d   :  { %387 = vmatprep.subr.bf16.mxu1 %v456_v1  ;;  %401 = vmatprep.subr.bf16.mxu0 %v456_v1 }
  0x20   :  { %388 = vmatpush3.bf16.msra.mxu1 %v423_v11  ;;  %402 = vmatpush3.bf16.msra.mxu0 %v428_v16 }
  0x21   :  { %403 = vmatprep.subr.bf16.mxu0 %v456_v1 }
  0x24   :  { %404 = vmatpush3.bf16.msra.mxu0 %v429_v17 }
  0x25   :  { %405 = vmatprep.subr.bf16.mxu0 %v456_v1 }
  0x28   :  { %406 = vmatpush3.bf16.msra.mxu0 %v430_v26 }
  0x29   :  { %407 = vmatprep.subr.bf16.mxu0 %v456_v1 }
  0x2c   :  { %408 = vmatpush3.bf16.msra.mxu0 %v431_v27 }
  0xd9   :  { %v79_v19 = vpop.f32.mrb[0].mxu0 }
  0xda   :  { %v80_v20 = vadd.f32 %v327_v18, %v79_v19  ;;  %v371_v21 = vpop.f32.mrb[1].mxu0 }
  0xdb   :  { %v82_v22 = vpop.f32.mrb[2].mxu0 }
  0xdc   :  { %v85_v23 = vmax.f32 %v80_v20, 0.0  ;;  %v372_v24 = vpop.f32.mrb[3].mxu0 }
  0xde   :  { %v86_v25 = vpack.c.bf16 %v85_v23, %v85_v23 }
  0xe0   :  { %390 = vmatmul.mubr.bf16.vlgmr.msra.gmra.mrb[0].mxu1 %v86_v25 }
 0x1b3   :  { %v192_v29 = vpop.f32.mrb[0].mxu1 }
 0x1b4   :  { %v193_v30 = vadd.f32 %v329_v28, %v192_v29  ;;  %v391_v31 = vpop.f32.mrb[1].mxu1 }
 0x1b5   :  { %v195_v32 = vpop.f32.mrb[2].mxu1 }
 0x1b6   :  { %v198_v33 = vmax.f32 %v193_v30, 0.0  ;;  %v392_v34 = vpop.f32.mrb[3].mxu1 }
 0x1b8   :  { %v199_v35 = vpack.c.bf16 %v198_v33, %v198_v33 }
 0x1ba   :  { %410 = vmatmul.mubr.bf16.vlgmr.msra.gmra.mrb[4].mxu0 %v199_v35 }
 0x28d   :  { %v305_v37 = vpop.f32.mrb[4].mxu0 }
 0x28e   :  { %v306_v38 = vadd.f32 %v338_v36, %v305_v37  ;;  %v411_v39 = vpop.f32.mrb[5].mxu0 }
 0x28f   :  { %v308_v40 = vpop.f32.mrb[6].mxu0 }
 0x290   :  { %v412_v41 = vpop.f32.mrb[7].mxu0  ;;  %312 = vst.msk [vmem:[#allocation2] sm:$0xff] %vm311_vm3, %v306_v38 }
 0x291   :  { %443 = shalt.err (!%p440_p4)
}
 0x292   :  { %s444_s6 = scalar_lea.hbm %s601_s7, 128 }
 0x293   :  { %p445_p5 = scmp.ne.s32.totalorder %s601_s7, %s444_s6  ;;  %p448_p6 = scmp.lt.u32.totalorder %s444_s6, %s601_s7 }
 0x295   :  { %p450_p7 = pnand %p448_p6, %p445_p5 }
 0x297   :  { %453 = shalt.err (!%p450_p7)
}
 0x298   :  { %322 = dma.vmem_to_hbm [thread:$0]  %s320_s15, 128, %s601_s7, [#allocation3]  }
 0x299   :  { %454 = dma.done.wait [#allocation3], 128  }
 0x29a   :  { %455 = vsyncadd [#allocation3], 4294967168 }
 0x29b   :  { %326 = vsyncpa [#allocation3], 1 }

</bundles_post_ra>
